<compile_context>
chip_gen: v7x
topology: tpu7x:2x2x1
jax: 0.10.0
libtpu: 0.0.40
codegen_flags: <defaults>
</compile_context>

<pallas_src>
import functools

import jax
import jax.numpy as jnp
from jax.experimental import pallas as pl
from jax.experimental.pallas import tpu as pltpu


def _round_up(x, m):
    return (x + m - 1) // m * m


# --------------------------------------------------------------------------
# Pallas kernel: matmul + bias, row- and column-tiled ("parallel","parallel").
# x / w in bf16, f32 accumulation, bias f32, output dtype selectable.
# --------------------------------------------------------------------------
def _matmul_bias_kernel(x_ref, w_ref, b_ref, o_ref):
    acc = jnp.dot(x_ref[...], w_ref[...], preferred_element_type=jnp.float32)
    o_ref[...] = (acc + b_ref[...]).astype(o_ref.dtype)


def matmul_bias(x_bf16, w_t_bf16, b_f32, out_dtype):
    """x: (N, K) bf16, w_t: (K, M) bf16, b: (1, M) f32 -> (N, M) out_dtype.
    K, M multiples of 128; N a multiple of 8."""
    N, K = x_bf16.shape
    M = w_t_bf16.shape[1]

    # Column block: full width if small, else a 512-1024 lane-dense slab.
    if M <= 1024:
        col_block = M
    else:
        col_block = next(cb for cb in (1024, 512, 256, 128) if M % cb == 0)

    # Row block: single block for small N, else 256-row tiles (pad + slice).
    if N <= 512:
        row_block, Np = N, N
    else:
        row_block = 256
        Np = _round_up(N, row_block)
    if Np != N:
        x_bf16 = jnp.pad(x_bf16, ((0, Np - N), (0, 0)))

    grid = (Np // row_block, M // col_block)
    out = pl.pallas_call(
        _matmul_bias_kernel,
        out_shape=jax.ShapeDtypeStruct((Np, M), out_dtype),
        grid_spec=pltpu.PrefetchScalarGridSpec(
            num_scalar_prefetch=0,
            grid=grid,
            in_specs=[
                pl.BlockSpec((row_block, K), lambda i, j: (i, 0)),
                pl.BlockSpec((K, col_block), lambda i, j: (0, j)),
                pl.BlockSpec((1, col_block), lambda i, j: (0, j)),
            ],
            out_specs=pl.BlockSpec((row_block, col_block), lambda i, j: (i, j)),
        ),
        compiler_params=pltpu.CompilerParams(
            dimension_semantics=("parallel", "parallel")
        ),
    )(x_bf16, w_t_bf16, b_f32)
    return out if Np == N else out[:N]


# --------------------------------------------------------------------------
# Pallas kernel: one LSTM layer's serial recurrence, grid over time.
# Per step: bf16 h_{t-1} @ W_hh on the MXU, f32 gate math, f32 h/c state in
# persistent VMEM scratch.  gx tile prefetch / output writeback are pipelined
# by Pallas against the per-step compute.
# --------------------------------------------------------------------------
def _lstm_step_kernel(gx_ref, whh_ref, out_ref, h_scr, c_scr):
    Hp = h_scr.shape[-1]

    @pl.when(pl.program_id(0) == 0)
    def _():
        h_scr[...] = jnp.zeros_like(h_scr)
        c_scr[...] = jnp.zeros_like(c_scr)

    gates = gx_ref[0].astype(jnp.float32) + jnp.dot(
        h_scr[...].astype(jnp.bfloat16), whh_ref[...],
        preferred_element_type=jnp.float32,
    )  # (B, 4*Hp) f32

    # PyTorch gate order i, f, g, o; every slice is lane-aligned (Hp % 128 == 0).
    i_g = jax.nn.sigmoid(gates[:, 0 * Hp:1 * Hp])
    f_g = jax.nn.sigmoid(gates[:, 1 * Hp:2 * Hp])
    g_g = jnp.tanh(gates[:, 2 * Hp:3 * Hp])
    o_g = jax.nn.sigmoid(gates[:, 3 * Hp:4 * Hp])

    c_new = f_g * c_scr[...] + i_g * g_g
    h_new = o_g * jnp.tanh(c_new)

    c_scr[...] = c_new
    h_scr[...] = h_new
    out_ref[0] = h_new.astype(out_ref.dtype)


def lstm_recurrence(gx, whh_t):
    """gx: (T1, Bp, 4*Hp) bf16 precomputed input gates, whh_t: (Hp, 4*Hp) bf16
    -> hidden sequence (T1, Bp, Hp) bf16, zero initial state."""
    T1, Bp, G = gx.shape
    Hp = whh_t.shape[0]
    assert G == 4 * Hp
    return pl.pallas_call(
        _lstm_step_kernel,
        out_shape=jax.ShapeDtypeStruct((T1, Bp, Hp), jnp.bfloat16),
        grid_spec=pltpu.PrefetchScalarGridSpec(
            num_scalar_prefetch=0,
            grid=(T1,),
            in_specs=[
                pl.BlockSpec((1, Bp, G), lambda t: (t, 0, 0)),
                pl.BlockSpec((Hp, G), lambda t: (0, 0)),   # resident weights
            ],
            out_specs=pl.BlockSpec((1, Bp, Hp), lambda t: (t, 0, 0)),
            scratch_shapes=[
                pltpu.VMEM((Bp, Hp), jnp.float32),  # h state (persists over grid)
                pltpu.VMEM((Bp, Hp), jnp.float32),  # c state
            ],
        ),
        compiler_params=pltpu.CompilerParams(
            dimension_semantics=("arbitrary",)  # serial recurrence
        ),
    )(gx, whh_t)


# --------------------------------------------------------------------------
# DecoderRNN forward
# --------------------------------------------------------------------------
@functools.partial(jax.jit, static_argnames=("vocab_dim",))
def decoder_rnn_forward(params, features, captions, *, vocab_dim):
    """
    features: (B, embed_dim) float32
    captions: (T, B) int32 token ids
    returns:  (T+1, B, vocab_dim) float32
    """
    E_p = params["embedding"].shape[1]
    B = features.shape[0]
    T = captions.shape[0]
    Bp = _round_up(B, 8)        # sublane-aligned batch
    T1 = T + 1

    # Embedding lookup (gather) - glue in plain JAX.
    # TODO(synk): nn.Dropout(0.5) in training mode omitted; eval semantics = identity.
    embeddings = jnp.take(params["embedding"], captions, axis=0)  # (T, B, E_p)

    # cat((features.unsqueeze(0), embeddings), dim=0); pad features/batch.
    feat_p = jnp.pad(features, ((0, 0), (0, E_p - features.shape[1])))
    seq = jnp.concatenate([feat_p[None, :, :], embeddings], axis=0)  # (T1, B, E_p)
    if Bp != B:
        seq = jnp.pad(seq, ((0, 0), (0, Bp - B), (0, 0)))

    x2d = seq.reshape(T1 * Bp, E_p).astype(jnp.bfloat16)

    # Stacked LSTM: hoisted lane-dense input projection over all timesteps
    # (one MXU matmul) + time-gridded serial recurrence per layer.
    for layer in params["lstm"]:
        Hp = layer["whh_t"].shape[0]
        gx = matmul_bias(x2d, layer["wih_t"], layer["b"], jnp.bfloat16)  # (T1*Bp, 4Hp)
        h_seq = lstm_recurrence(gx.reshape(T1, Bp, 4 * Hp), layer["whh_t"])
        x2d = h_seq.reshape(T1 * Bp, Hp)  # bf16

    # Final linear; padded batch rows / vocab columns sliced off.
    logits_p = matmul_bias(x2d, params["lin_w_t"], params["lin_b"], jnp.float32)
    logits_p = logits_p.reshape(T1, Bp, -1)
    return logits_p[:, :B, :vocab_dim]


# --------------------------------------------------------------------------
# Deterministic parameter construction (synthetic, matches nn.Module shapes),
# packed into transposed, lane-padded, bf16 layouts.  Zero padding is exact:
# padded gate/hidden lanes stay identically zero through the recurrence.
# --------------------------------------------------------------------------
def _pack_lstm_layer(w_ih, w_hh, b_ih, b_hh, H, H_p, in_dim, in_p):
    # w_ih: (4H, in), w_hh: (4H, H), gate row order i,f,g,o (PyTorch).
    wih_t = jnp.zeros((in_p, 4 * H_p), jnp.float32)
    whh_t = jnp.zeros((H_p, 4 * H_p), jnp.float32)
    bias = jnp.zeros((1, 4 * H_p), jnp.float32)
    b_sum = b_ih + b_hh
    for g in range(4):
        wih_t = wih_t.at[:in_dim, g * H_p:g * H_p + H].set(w_ih[g * H:(g + 1) * H, :].T)
        whh_t = whh_t.at[:H, g * H_p:g * H_p + H].set(w_hh[g * H:(g + 1) * H, :].T)
        bias = bias.at[0, g * H_p:g * H_p + H].set(b_sum[g * H:(g + 1) * H])
    return {
        "wih_t": wih_t.astype(jnp.bfloat16),
        "whh_t": whh_t.astype(jnp.bfloat16),
        "b": bias,  # f32
    }


def init_params(key, embed_dim, hidden_dim, vocab_dim, num_layers):
    E_p = _round_up(embed_dim, 128)
    H_p = _round_up(hidden_dim, 128)
    # Avoid 128-wide column-block degeneracy for large vocabularies.
    V_p = _round_up(vocab_dim, 128) if vocab_dim <= 1024 else _round_up(vocab_dim, 1024)

    keys = jax.random.split(key, 3 + 4 * num_layers)
    it = iter(keys)
    params = {}

    emb = 0.1 * jax.random.normal(next(it), (vocab_dim, embed_dim), jnp.float32)
    params["embedding"] = jnp.pad(emb, ((0, 0), (0, E_p - embed_dim)))

    lstm = []
    for layer_idx in range(num_layers):
        in_dim = embed_dim if layer_idx == 0 else hidden_dim
        in_p = E_p if layer_idx == 0 else H_p
        w_ih = 0.1 * jax.random.normal(next(it), (4 * hidden_dim, in_dim), jnp.float32)
        w_hh = 0.1 * jax.random.normal(next(it), (4 * hidden_dim, hidden_dim), jnp.float32)
        b_ih = 0.1 * jax.random.normal(next(it), (4 * hidden_dim,), jnp.float32)
        b_hh = 0.1 * jax.random.normal(next(it), (4 * hidden_dim,), jnp.float32)
        lstm.append(_pack_lstm_layer(w_ih, w_hh, b_ih, b_hh,
                                     hidden_dim, H_p, in_dim, in_p))
    params["lstm"] = lstm

    lin_w = 0.1 * jax.random.normal(next(it), (vocab_dim, hidden_dim), jnp.float32)
    lin_b = 0.1 * jax.random.normal(next(it), (vocab_dim,), jnp.float32)
    params["lin_w_t"] = (
        jnp.zeros((H_p, V_p), jnp.float32).at[:hidden_dim, :vocab_dim].set(lin_w.T)
    ).astype(jnp.bfloat16)
    params["lin_b"] = jnp.zeros((1, V_p), jnp.float32).at[0, :vocab_dim].set(lin_b)
    return params


if __name__ == "__main__":
    embed_dim, hidden_dim, vocab_dim, num_layers = 32, 32, 64, 2
    B, T = 2, 8

    key = jax.random.PRNGKey(0)
    k_param, k_feat, k_cap = jax.random.split(key, 3)

    params = init_params(k_param, embed_dim, hidden_dim, vocab_dim, num_layers)
    features = jax.random.normal(k_feat, (B, embed_dim), jnp.float32)
    captions = jax.random.randint(k_cap, (T, B), 0, vocab_dim, jnp.int32)

    out = decoder_rnn_forward(params, features, captions, vocab_dim=vocab_dim)
    out = jax.block_until_ready(out)
    assert out.shape == (T + 1, B, vocab_dim), out.shape
    assert jnp.isfinite(out).all()
    print("KERNEL_OK")
</pallas_src>

<mosaic_0001>
module attributes {stable_mosaic.version = 11 : i64} {
  func.func @_lstm_step_kernel(%arg0: i32, %arg1: memref<1x8x512xbf16, #tpu.memory_space<vmem>>, %arg2: memref<128x512xbf16, #tpu.memory_space<vmem>>, %arg3: memref<1x8x128xbf16, #tpu.memory_space<vmem>>, %arg4: memref<8x128xf32, #tpu.memory_space<vmem>>, %arg5: memref<8x128xf32, #tpu.memory_space<vmem>>) attributes {dimension_semantics = [#tpu.dimension_semantics<arbitrary>], iteration_bounds = array<i64: 9>, scalar_prefetch = 0 : i64, scratch_operands = 2 : i64, tpu.core_type = #tpu.core_type<tc>, window_params = [{transform_indices = @transform_0, window_bounds = array<i64: 1, 8, 512>}, {pipeline_mode = #tpu.pipeline_mode<synchronous>, transform_indices = @transform_1, window_bounds = array<i64: 128, 512>}, {transform_indices = @transform_2, window_bounds = array<i64: 1, 8, 128>}]} {
    %c0_i32 = arith.constant 0 : i32
    %0 = arith.cmpi eq, %arg0, %c0_i32 : i32
    %1 = arith.extui %0 : i1 to i32
    %c0_i32_0 = arith.constant 0 : i32
    %2 = arith.cmpi ne, %1, %c0_i32_0 : i32
    scf.if %2 {
      %cst_19 = arith.constant 0.000000e+00 : f32
      %43 = vector.broadcast %cst_19 : f32 to vector<8x128xf32>
      %c0_20 = arith.constant 0 : index
      %c0_21 = arith.constant 0 : index
      %44 = vector.load %arg4[%c0_20, %c0_21] : memref<8x128xf32, #tpu.memory_space<vmem>>, vector<8x128xf32>
      tpu.vector_store %arg4[%c0_20, %c0_21], %43 {strides = array<i32>} : memref<8x128xf32, #tpu.memory_space<vmem>>, vector<8x128xf32>,
      %cst_22 = arith.constant 0.000000e+00 : f32
      %45 = vector.broadcast %cst_22 : f32 to vector<8x128xf32>
      %c0_23 = arith.constant 0 : index
      %c0_24 = arith.constant 0 : index
      %46 = vector.load %arg5[%c0_23, %c0_24] : memref<8x128xf32, #tpu.memory_space<vmem>>, vector<8x128xf32>
      tpu.vector_store %arg5[%c0_23, %c0_24], %45 {strides = array<i32>} : memref<8x128xf32, #tpu.memory_space<vmem>>, vector<8x128xf32>,
    } else {
    }
    %c0 = arith.constant 0 : index
    %c0_1 = arith.constant 0 : index
    %c0_2 = arith.constant 0 : index
    %3 = vector.load %arg1[%c0, %c0_1, %c0_2] : memref<1x8x512xbf16, #tpu.memory_space<vmem>>, vector<1x8x512xbf16>
    %4 = vector.shape_cast %3 : vector<1x8x512xbf16> to vector<8x512xbf16>
    %5 = arith.extf %4 : vector<8x512xbf16> to vector<8x512xf32>
    %c0_3 = arith.constant 0 : index
    %c0_4 = arith.constant 0 : index
    %6 = vector.load %arg4[%c0_3, %c0_4] : memref<8x128xf32, #tpu.memory_space<vmem>>, vector<8x128xf32>
    %7 = arith.truncf %6 : vector<8x128xf32> to vector<8x128xbf16>
    %c0_5 = arith.constant 0 : index
    %c0_6 = arith.constant 0 : index
    %8 = vector.load %arg2[%c0_5, %c0_6] : memref<128x512xbf16, #tpu.memory_space<vmem>>, vector<128x512xbf16>
    %cst = arith.constant dense<0.000000e+00> : vector<8x512xf32>
    %9 = tpu.matmul %7, %8, %cst {dimension_numbers = #tpu.dot_dimension_numbers<[1], [0], [0], [1], [0, 0, 1, 1], [], []>} : vector<8x128xbf16>, vector<128x512xbf16>, vector<8x512xf32> -> vector<8x512xf32>
    %10 = arith.addf %5, %9 : vector<8x512xf32>
    %11 = vector.extract_strided_slice %10 {offsets = [0, 0], sizes = [8, 128], strides = [1, 1]} : vector<8x512xf32> to vector<8x128xf32>
    %12 = arith.negf %11 : vector<8x128xf32>
    %13 = math.exp %12 : vector<8x128xf32>
    %cst_7 = arith.constant 1.000000e+00 : f32
    %14 = vector.broadcast %cst_7 : f32 to vector<8x128xf32>
    %15 = arith.addf %14, %13 : vector<8x128xf32>
    %16 = arith.divf %14, %15 : vector<8x128xf32>
    %17 = vector.extract_strided_slice %10 {offsets = [0, 128], sizes = [8, 128], strides = [1, 1]} : vector<8x512xf32> to vector<8x128xf32>
    %18 = arith.negf %17 : vector<8x128xf32>
    %19 = math.exp %18 : vector<8x128xf32>
    %cst_8 = arith.constant 1.000000e+00 : f32
    %20 = vector.broadcast %cst_8 : f32 to vector<8x128xf32>
    %21 = arith.addf %20, %19 : vector<8x128xf32>
    %22 = arith.divf %20, %21 : vector<8x128xf32>
    %23 = vector.extract_strided_slice %10 {offsets = [0, 256], sizes = [8, 128], strides = [1, 1]} : vector<8x512xf32> to vector<8x128xf32>
    %24 = math.tanh %23 : vector<8x128xf32>
    %25 = vector.extract_strided_slice %10 {offsets = [0, 384], sizes = [8, 128], strides = [1, 1]} : vector<8x512xf32> to vector<8x128xf32>
    %26 = arith.negf %25 : vector<8x128xf32>
    %27 = math.exp %26 : vector<8x128xf32>
    %cst_9 = arith.constant 1.000000e+00 : f32
    %28 = vector.broadcast %cst_9 : f32 to vector<8x128xf32>
    %29 = arith.addf %28, %27 : vector<8x128xf32>
    %30 = arith.divf %28, %29 : vector<8x128xf32>
    %c0_10 = arith.constant 0 : index
    %c0_11 = arith.constant 0 : index
    %31 = vector.load %arg5[%c0_10, %c0_11] : memref<8x128xf32, #tpu.memory_space<vmem>>, vector<8x128xf32>
    %32 = arith.mulf %22, %31 : vector<8x128xf32>
    %33 = arith.mulf %16, %24 : vector<8x128xf32>
    %34 = arith.addf %32, %33 : vector<8x128xf32>
    %35 = math.tanh %34 : vector<8x128xf32>
    %36 = arith.mulf %30, %35 : vector<8x128xf32>
    %c0_12 = arith.constant 0 : index
    %c0_13 = arith.constant 0 : index
    %37 = vector.load %arg5[%c0_12, %c0_13] : memref<8x128xf32, #tpu.memory_space<vmem>>, vector<8x128xf32>
    tpu.vector_store %arg5[%c0_12, %c0_13], %34 {strides = array<i32>} : memref<8x128xf32, #tpu.memory_space<vmem>>, vector<8x128xf32>,
    %c0_14 = arith.constant 0 : index
    %c0_15 = arith.constant 0 : index
    %38 = vector.load %arg4[%c0_14, %c0_15] : memref<8x128xf32, #tpu.memory_space<vmem>>, vector<8x128xf32>
    tpu.vector_store %arg4[%c0_14, %c0_15], %36 {strides = array<i32>} : memref<8x128xf32, #tpu.memory_space<vmem>>, vector<8x128xf32>,
    %39 = arith.truncf %36 : vector<8x128xf32> to vector<8x128xbf16>
    %c0_16 = arith.constant 0 : index
    %c0_17 = arith.constant 0 : index
    %c0_18 = arith.constant 0 : index
    %40 = vector.load %arg3[%c0_16, %c0_17, %c0_18] : memref<1x8x128xbf16, #tpu.memory_space<vmem>>, vector<1x8x128xbf16>
    %41 = vector.shape_cast %40 : vector<1x8x128xbf16> to vector<8x128xbf16>
    %42 = vector.shape_cast %39 : vector<8x128xbf16> to vector<1x8x128xbf16>
    tpu.vector_store %arg3[%c0_16, %c0_17, %c0_18], %42 {strides = array<i32>} : memref<1x8x128xbf16, #tpu.memory_space<vmem>>, vector<1x8x128xbf16>,
    return
  }
  func.func @transform_0(%arg0: i32) -> (i32, i32, i32) {
    %c0_i32 = arith.constant 0 : i32
    %c0_i32_0 = arith.constant 0 : i32
    %c0_i32_1 = arith.constant 0 : i32
    return %arg0, %c0_i32, %c0_i32_0 : i32, i32, i32
  }
  func.func @transform_1(%arg0: i32) -> (i32, i32) {
    %c0_i32 = arith.constant 0 : i32
    %c0_i32_0 = arith.constant 0 : i32
    %c0_i32_1 = arith.constant 0 : i32
    return %c0_i32, %c0_i32_0 : i32, i32
  }
  func.func @transform_2(%arg0: i32) -> (i32, i32, i32) {
    %c0_i32 = arith.constant 0 : i32
    %c0_i32_0 = arith.constant 0 : i32
    %c0_i32_1 = arith.constant 0 : i32
    return %arg0, %c0_i32, %c0_i32_0 : i32, i32, i32
  }
}

module attributes {stable_mosaic.version = 11 : i64} {
  func.func @_matmul_bias_kernel(%arg0: i32, %arg1: i32, %arg2: memref<72x128xbf16, #tpu.memory_space<vmem>>, %arg3: memref<128x512xbf16, #tpu.memory_space<vmem>>, %arg4: memref<1x512xf32, #tpu.memory_space<vmem>>, %arg5: memref<72x512xbf16, #tpu.memory_space<vmem>>) attributes {dimension_semantics = [#tpu.dimension_semantics<parallel>, #tpu.dimension_semantics<parallel>], iteration_bounds = array<i64: 1, 1>, scalar_prefetch = 0 : i64, scratch_operands = 0 : i64, tpu.core_type = #tpu.core_type<tc>, window_params = [{transform_indices = @transform_0, window_bounds = array<i64: 72, 128>}, {transform_indices = @transform_1, window_bounds = array<i64: 128, 512>}, {transform_indices = @transform_2, window_bounds = array<i64: 1, 512>}, {transform_indices = @transform_3, window_bounds = array<i64: 72, 512>}]} {
    %c0 = arith.constant 0 : index
    %c0_0 = arith.constant 0 : index
    %0 = vector.load %arg2[%c0, %c0_0] : memref<72x128xbf16, #tpu.memory_space<vmem>>, vector<72x128xbf16>
    %c0_1 = arith.constant 0 : index
    %c0_2 = arith.constant 0 : index
    %1 = vector.load %arg3[%c0_1, %c0_2] : memref<128x512xbf16, #tpu.memory_space<vmem>>, vector<128x512xbf16>
    %cst = arith.constant dense<0.000000e+00> : vector<72x512xf32>
    %2 = tpu.matmul %0, %1, %cst {dimension_numbers = #tpu.dot_dimension_numbers<[1], [0], [0], [1], [0, 0, 1, 1], [], []>} : vector<72x128xbf16>, vector<128x512xbf16>, vector<72x512xf32> -> vector<72x512xf32>
    %c0_3 = arith.constant 0 : index
    %c0_4 = arith.constant 0 : index
    %3 = vector.load %arg4[%c0_3, %c0_4] : memref<1x512xf32, #tpu.memory_space<vmem>>, vector<1x512xf32>
    %4 = vector.broadcast %3 : vector<1x512xf32> to vector<72x512xf32>
    %5 = arith.addf %2, %4 : vector<72x512xf32>
    %6 = arith.truncf %5 : vector<72x512xf32> to vector<72x512xbf16>
    %c0_5 = arith.constant 0 : index
    %c0_6 = arith.constant 0 : index
    %7 = vector.load %arg5[%c0_5, %c0_6] : memref<72x512xbf16, #tpu.memory_space<vmem>>, vector<72x512xbf16>
    tpu.vector_store %arg5[%c0_5, %c0_6], %6 {strides = array<i32>} : memref<72x512xbf16, #tpu.memory_space<vmem>>, vector<72x512xbf16>,
    return
  }
  func.func @transform_0(%arg0: i32, %arg1: i32) -> (i32, i32) {
    %c0_i32 = arith.constant 0 : i32
    %c0_i32_0 = arith.constant 0 : i32
    return %arg0, %c0_i32 : i32, i32
  }
  func.func @transform_1(%arg0: i32, %arg1: i32) -> (i32, i32) {
    %c0_i32 = arith.constant 0 : i32
    %c0_i32_0 = arith.constant 0 : i32
    return %c0_i32, %arg1 : i32, i32
  }
  func.func @transform_2(%arg0: i32, %arg1: i32) -> (i32, i32) {
    %c0_i32 = arith.constant 0 : i32
    %c0_i32_0 = arith.constant 0 : i32
    return %c0_i32, %arg1 : i32, i32
  }
  func.func @transform_3(%arg0: i32, %arg1: i32) -> (i32, i32) {
    %c0_i32 = arith.constant 0 : i32
    return %arg0, %arg1 : i32, i32
  }
}

module attributes {stable_mosaic.version = 11 : i64} {
  func.func @_matmul_bias_kernel(%arg0: i32, %arg1: i32, %arg2: memref<72x128xbf16, #tpu.memory_space<vmem>>, %arg3: memref<128x128xbf16, #tpu.memory_space<vmem>>, %arg4: memref<1x128xf32, #tpu.memory_space<vmem>>, %arg5: memref<72x128xf32, #tpu.memory_space<vmem>>) attributes {dimension_semantics = [#tpu.dimension_semantics<parallel>, #tpu.dimension_semantics<parallel>], iteration_bounds = array<i64: 1, 1>, scalar_prefetch = 0 : i64, scratch_operands = 0 : i64, tpu.core_type = #tpu.core_type<tc>, window_params = [{transform_indices = @transform_0, window_bounds = array<i64: 72, 128>}, {transform_indices = @transform_1, window_bounds = array<i64: 128, 128>}, {transform_indices = @transform_2, window_bounds = array<i64: 1, 128>}, {transform_indices = @transform_3, window_bounds = array<i64: 72, 128>}]} {
    %c0 = arith.constant 0 : index
    %c0_0 = arith.constant 0 : index
    %0 = vector.load %arg2[%c0, %c0_0] : memref<72x128xbf16, #tpu.memory_space<vmem>>, vector<72x128xbf16>
    %c0_1 = arith.constant 0 : index
    %c0_2 = arith.constant 0 : index
    %1 = vector.load %arg3[%c0_1, %c0_2] : memref<128x128xbf16, #tpu.memory_space<vmem>>, vector<128x128xbf16>
    %cst = arith.constant dense<0.000000e+00> : vector<72x128xf32>
    %2 = tpu.matmul %0, %1, %cst {dimension_numbers = #tpu.dot_dimension_numbers<[1], [0], [0], [1], [0, 0, 1, 1], [], []>} : vector<72x128xbf16>, vector<128x128xbf16>, vector<72x128xf32> -> vector<72x128xf32>
    %c0_3 = arith.constant 0 : index
    %c0_4 = arith.constant 0 : index
    %3 = vector.load %arg4[%c0_3, %c0_4] : memref<1x128xf32, #tpu.memory_space<vmem>>, vector<1x128xf32>
    %4 = vector.broadcast %3 : vector<1x128xf32> to vector<72x128xf32>
    %5 = arith.addf %2, %4 : vector<72x128xf32>
    %c0_5 = arith.constant 0 : index
    %c0_6 = arith.constant 0 : index
    %6 = vector.load %arg5[%c0_5, %c0_6] : memref<72x128xf32, #tpu.memory_space<vmem>>, vector<72x128xf32>
    tpu.vector_store %arg5[%c0_5, %c0_6], %5 {strides = array<i32>} : memref<72x128xf32, #tpu.memory_space<vmem>>, vector<72x128xf32>,
    return
  }
  func.func @transform_0(%arg0: i32, %arg1: i32) -> (i32, i32) {
    %c0_i32 = arith.constant 0 : i32
    %c0_i32_0 = arith.constant 0 : i32
    return %arg0, %c0_i32 : i32, i32
  }
  func.func @transform_1(%arg0: i32, %arg1: i32) -> (i32, i32) {
    %c0_i32 = arith.constant 0 : i32
    %c0_i32_0 = arith.constant 0 : i32
    return %c0_i32, %arg1 : i32, i32
  }
  func.func @transform_2(%arg0: i32, %arg1: i32) -> (i32, i32) {
    %c0_i32 = arith.constant 0 : i32
    %c0_i32_0 = arith.constant 0 : i32
    return %c0_i32, %arg1 : i32, i32
  }
  func.func @transform_3(%arg0: i32, %arg1: i32) -> (i32, i32) {
    %c0_i32 = arith.constant 0 : i32
    return %arg0, %arg1 : i32, i32
  }
}

module attributes {stable_mosaic.version = 11 : i64} {
  func.func @_matmul_bias_kernel(%arg0: i32, %arg1: i32, %arg2: memref<72x128xbf16, #tpu.memory_space<vmem>>, %arg3: memref<128x512xbf16, #tpu.memory_space<vmem>>, %arg4: memref<1x512xf32, #tpu.memory_space<vmem>>, %arg5: memref<72x512xbf16, #tpu.memory_space<vmem>>) attributes {dimension_semantics = [#tpu.dimension_semantics<parallel>, #tpu.dimension_semantics<parallel>], iteration_bounds = array<i64: 1, 1>, scalar_prefetch = 0 : i64, scratch_operands = 0 : i64, tpu.core_type = #tpu.core_type<tc>, window_params = [{transform_indices = @transform_0, window_bounds = array<i64: 72, 128>}, {transform_indices = @transform_1, window_bounds = array<i64: 128, 512>}, {transform_indices = @transform_2, window_bounds = array<i64: 1, 512>}, {transform_indices = @transform_3, window_bounds = array<i64: 72, 512>}]} {
    %c0 = arith.constant 0 : index
    %c0_0 = arith.constant 0 : index
    %0 = vector.load %arg2[%c0, %c0_0] : memref<72x128xbf16, #tpu.memory_space<vmem>>, vector<72x128xbf16>
    %c0_1 = arith.constant 0 : index
    %c0_2 = arith.constant 0 : index
    %1 = vector.load %arg3[%c0_1, %c0_2] : memref<128x512xbf16, #tpu.memory_space<vmem>>, vector<128x512xbf16>
    %cst = arith.constant dense<0.000000e+00> : vector<72x512xf32>
    %2 = tpu.matmul %0, %1, %cst {dimension_numbers = #tpu.dot_dimension_numbers<[1], [0], [0], [1], [0, 0, 1, 1], [], []>} : vector<72x128xbf16>, vector<128x512xbf16>, vector<72x512xf32> -> vector<72x512xf32>
    %c0_3 = arith.constant 0 : index
    %c0_4 = arith.constant 0 : index
    %3 = vector.load %arg4[%c0_3, %c0_4] : memref<1x512xf32, #tpu.memory_space<vmem>>, vector<1x512xf32>
    %4 = vector.broadcast %3 : vector<1x512xf32> to vector<72x512xf32>
    %5 = arith.addf %2, %4 : vector<72x512xf32>
    %6 = arith.truncf %5 : vector<72x512xf32> to vector<72x512xbf16>
    %c0_5 = arith.constant 0 : index
    %c0_6 = arith.constant 0 : index
    %7 = vector.load %arg5[%c0_5, %c0_6] : memref<72x512xbf16, #tpu.memory_space<vmem>>, vector<72x512xbf16>
    tpu.vector_store %arg5[%c0_5, %c0_6], %6 {strides = array<i32>} : memref<72x512xbf16, #tpu.memory_space<vmem>>, vector<72x512xbf16>,
    return
  }
  func.func @transform_0(%arg0: i32, %arg1: i32) -> (i32, i32) {
    %c0_i32 = arith.constant 0 : i32
    %c0_i32_0 = arith.constant 0 : i32
    return %arg0, %c0_i32 : i32, i32
  }
  func.func @transform_1(%arg0: i32, %arg1: i32) -> (i32, i32) {
    %c0_i32 = arith.constant 0 : i32
    %c0_i32_0 = arith.constant 0 : i32
    return %c0_i32, %arg1 : i32, i32
  }
  func.func @transform_2(%arg0: i32, %arg1: i32) -> (i32, i32) {
    %c0_i32 = arith.constant 0 : i32
    %c0_i32_0 = arith.constant 0 : i32
    return %c0_i32, %arg1 : i32, i32
  }
  func.func @transform_3(%arg0: i32, %arg1: i32) -> (i32, i32) {
    %c0_i32 = arith.constant 0 : i32
    return %arg0, %arg1 : i32, i32
  }
}

</mosaic_0001>

<bundles_post_ra>
// kernel: decoder_rnn_forward.9
= control target key start
LH: loop header
LB: loop body
LE: loop exit
PB: predicated region body
PF: predicated region fallthrough
CT: control target
= control target key end

     0   :  { %v302_v0 = vmov 0.0   ;;  %vm303_vm0 = vmmov 0   ;;  %s398_s1 = inlined_call_operand.vmem [shape: bf16[128,128], index: 1, kind: input, shape index: {}]   ;;  %s399_s0 = inlined_call_operand.vmem [shape: bf16[72,128], index: 0, kind: input, shape index: {}]   ;;  %s400_s2 = inlined_call_operand.vmem [shape: f32[1,128], index: 2, kind: input, shape index: {}]   ;;  %s401_s3 = inlined_call_operand.vmem [shape: f32[72,128], index: 3, kind: output, shape index: {}]  }
   0x1   :  { %235 = vmatprep.subr.bf16.mxu0 %v302_v0  ;;  %v289_v1 = vld [vmem:[%s398_s1] sm:$0xff]   ;;  %271 = vmatprep.subr.bf16.mxu1 %v302_v0  ;;  %v290_v2 = vld [vmem:[%s398_s1 + $0x8] sm:$0xff]   ;;  %v291_v3 = vld [vmem:[%s398_s1 + $0x10] sm:$0xff]  }
   0x2   :  { %251 = vmatprep.mubr.msk.bf16.mxu0 %vm303_vm0, %v302_v0  ;;  %263 = vmatprep.mubr.msk.bf16.mxu1 %vm303_vm0, %v302_v0  ;;  %v292_v4 = vld [vmem:[%s398_s1 + $0x18] sm:$0xff]   ;;  %v293_v5 = vld [vmem:[%s398_s1 + $0x20] sm:$0xff]   ;;  %v294_v6 = vld [vmem:[%s398_s1 + $0x28] sm:$0xff]  }
   0x3   :  { %236 = vmatpush3.bf16.msra.mxu0 %v289_v1  ;;  %279 = vmatpush3.bf16.msra.mxu1 %v289_v1  ;;  %v295_v7 = vld [vmem:[%s398_s1 + $0x30] sm:$0xff]   ;;  %v296_v8 = vld [vmem:[%s398_s1 + $0x38] sm:$0xff]   ;;  %v297_v9 = vld [vmem:[%s399_s0] sm:$0xff]  }
   0x4   :  { %237 = vmatprep.subr.bf16.mxu0 %v302_v0  ;;  %272 = vmatprep.subr.bf16.mxu1 %v302_v0  ;;  %v298_v10 = vld [vmem:[%s399_s0 + $0x18] sm:$0xff]   ;;  %v299_v11 = vld [vmem:[%s399_s0 + $0x8] sm:$0xff]   ;;  %v300_v12 = vld [vmem:[%s399_s0 + $0x20] ss:$0 sps:$4 sm:$0xff]  }
   0x5   :  { %v301_v13 = vld [vmem:[%s399_s0 + $0x10] sm:$0xff]   ;;  %v208_v14 = vld [vmem:[%s400_s2] ss:$0 sm:$0xff] }
   0x7   :  { %238 = vmatpush3.bf16.msra.mxu0 %v290_v2  ;;  %280 = vmatpush3.bf16.msra.mxu1 %v290_v2 }
   0x8   :  { %239 = vmatprep.subr.bf16.mxu0 %v302_v0  ;;  %273 = vmatprep.subr.bf16.mxu1 %v302_v0 }
   0xb   :  { %240 = vmatpush3.bf16.msra.mxu0 %v291_v3  ;;  %281 = vmatpush3.bf16.msra.mxu1 %v291_v3 }
   0xc   :  { %241 = vmatprep.subr.bf16.mxu0 %v302_v0  ;;  %274 = vmatprep.subr.bf16.mxu1 %v302_v0 }
   0xf   :  { %242 = vmatpush3.bf16.msra.mxu0 %v292_v4  ;;  %282 = vmatpush3.bf16.msra.mxu1 %v292_v4 }
  0x10   :  { %243 = vmatprep.subr.bf16.mxu0 %v302_v0  ;;  %275 = vmatprep.subr.bf16.mxu1 %v302_v0 }
  0x13   :  { %244 = vmatpush3.bf16.msra.mxu0 %v293_v5  ;;  %283 = vmatpush3.bf16.msra.mxu1 %v293_v5 }
  0x14   :  { %245 = vmatprep.subr.bf16.mxu0 %v302_v0  ;;  %276 = vmatprep.subr.bf16.mxu1 %v302_v0 }
  0x17   :  { %246 = vmatpush3.bf16.msra.mxu0 %v294_v6  ;;  %284 = vmatpush3.bf16.msra.mxu1 %v294_v6 }
  0x18   :  { %247 = vmatprep.subr.bf16.mxu0 %v302_v0  ;;  %277 = vmatprep.subr.bf16.mxu1 %v302_v0 }
  0x1b   :  { %248 = vmatpush3.bf16.msra.mxu0 %v295_v7  ;;  %285 = vmatpush3.bf16.msra.mxu1 %v295_v7 }
  0x1c   :  { %249 = vmatprep.subr.bf16.mxu0 %v302_v0  ;;  %278 = vmatprep.subr.bf16.mxu1 %v302_v0 }
  0x1f   :  { %250 = vmatpush3.bf16.msra.mxu0 %v296_v8  ;;  %286 = vmatpush3.bf16.msra.mxu1 %v296_v8 }
  0x22   :  { %252 = vmatmul.mubr.bf16.vlgmr.msra.gmra.mrb[0].mxu0 %v297_v9  ;;  %264 = vmatmul.mubr.bf16.vlgmr.msra.gmra.mrb[0].mxu1 %v298_v10 }
  0x23   :  { %255 = vmatprep.mubr.msk.bf16.mxu0 %vm303_vm0, %v302_v0  ;;  %267 = vmatprep.mubr.msk.bf16.mxu1 %vm303_vm0, %v302_v0 }
  0x2a   :  { %256 = vmatmul.mubr.bf16.gmra.mrb[4].mxu0 %v299_v11  ;;  %268 = vmatmul.mubr.bf16.gmra.mrb[4].mxu1 %v300_v12 }
  0x2b   :  { %259 = vmatprep.mubr.msk.bf16.mxu0 %vm303_vm0, %v302_v0 }
  0x32   :  { %260 = vmatmul.mubr.bf16.gmra.mrb[8].mxu0 %v301_v13 }
  0xf5   :  { %v157_v15 = vpop.f32.mrb[0].mxu0  ;;  %v181_v16 = vpop.f32.mrb[0].mxu1 }
  0xf6   :  { %v158_v17 = vadd.f32 %v208_v14, %v157_v15  ;;  %v253_v18 = vpop.f32.mrb[1].mxu0  ;;  %v182_v19 = vadd.f32 %v208_v14, %v181_v16  ;;  %v265_v20 = vpop.f32.mrb[1].mxu1 }
  0xf7   :  { %v160_v21 = vpop.f32.mrb[2].mxu0  ;;  %v184_v22 = vpop.f32.mrb[2].mxu1 }
  0xf8   :  { %195 = vst [vmem:[%s401_s3] sm:$0xff] %v158_v17  ;;  %v161_v23 = vadd.f32 %v208_v14, %v160_v21  ;;  %v254_v24 = vpop.f32.mrb[3].mxu0  ;;  %201 = vst [vmem:[%s401_s3 + $0x30] sm:$0xff] %v182_v19  ;;  %v185_v25 = vadd.f32 %v208_v14, %v184_v22  ;;  %v266_v26 = vpop.f32.mrb[3].mxu1 }
  0xfa   :  { %196 = vst [vmem:[%s401_s3 + $0x8] sm:$0xff] %v161_v23  ;;  %202 = vst [vmem:[%s401_s3 + $0x38] sm:$0xff] %v185_v25 }
  0xfd   :  { %v165_v27 = vpop.f32.mrb[4].mxu0  ;;  %v189_v28 = vpop.f32.mrb[4].mxu1 }
  0xfe   :  { %v166_v29 = vadd.f32 %v208_v14, %v165_v27  ;;  %v257_v30 = vpop.f32.mrb[5].mxu0  ;;  %v190_v31 = vadd.f32 %v208_v14, %v189_v28  ;;  %v269_v32 = vpop.f32.mrb[5].mxu1 }
  0xff   :  { %v168_v33 = vpop.f32.mrb[6].mxu0  ;;  %v192_v34 = vpop.f32.mrb[6].mxu1 }
 0x100   :  { %197 = vst [vmem:[%s401_s3 + $0x10] sm:$0xff] %v166_v29  ;;  %v169_v35 = vadd.f32 %v208_v14, %v168_v33  ;;  %v258_v36 = vpop.f32.mrb[7].mxu0  ;;  %203 = vst [vmem:[%s401_s3 + $0x40] sm:$0xff] %v190_v31  ;;  %v270_v37 = vpop.f32.mrb[7].mxu1 }
 0x102   :  { %198 = vst [vmem:[%s401_s3 + $0x18] sm:$0xff] %v169_v35 }
 0x105   :  { %v173_v38 = vpop.f32.mrb[8].mxu0 }
 0x106   :  { %v174_v39 = vadd.f32 %v208_v14, %v173_v38  ;;  %v261_v40 = vpop.f32.mrb[9].mxu0 }
 0x107   :  { %v176_v41 = vpop.f32.mrb[10].mxu0 }
 0x108   :  { %199 = vst [vmem:[%s401_s3 + $0x20] sm:$0xff] %v174_v39  ;;  %v177_v42 = vadd.f32 %v208_v14, %v176_v41  ;;  %v262_v43 = vpop.f32.mrb[11].mxu0 }
 0x10a   :  { %200 = vst [vmem:[%s401_s3 + $0x28] sm:$0xff] %v177_v42 }

// kernel: decoder_rnn_forward.6
= control target key start
LH: loop header
LB: loop body
LE: loop exit
PB: predicated region body
PF: predicated region fallthrough
CT: control target
= control target key end

     0   :  { %s663_s9 = smov 0   ;;  %s783_s0 = inlined_call_operand.vmem [shape: bf16[9,8,512], index: 0, kind: input, shape index: {}]   ;;  %s784_s1 = inlined_call_operand.vmem [shape: bf16[128,512], index: 1, kind: input, shape index: {}]   ;;  %s785_s2 = inlined_call_operand.vmem [shape: bf16[9,8,128], index: 2, kind: output, shape index: {}]  }
   0x1 LB: > { %s517_s10 = sadd.s32 4294967295, %s644_s9   ;;  %p521_p0 = scmp.ge.s32.totalorder %s644_s9, 1  ;;  %s644_s9 = sphi %s663_s9, %s12_s9  }
   0x2   : > { %p112_p1 = scmp.lt.s32.totalorder %s644_s9, 10 }
   0x4   : > { %p113_p2 = pnand %p521_p0, %p112_p1 }
   0x5   : > { %p133_p3 = scmp.lt.s32.totalorder (!%p113_p2), %s517_s10, 8  ;;  %p525_p4 = scmp.ne.s32.totalorder (!%p113_p2), %s517_s10, 0 }
   0x6   : > { %116 = sbr.rel (%p113_p2) target bundleno = 316 (0x13c), region = 28 }
   0xd   : > { %s134_s11 = scalar_select %p133_p3, %s517_s10, 8 }
   0xe   : > { %146 = sbr.rel (%p525_p4) target bundleno = 21 (0x15), region = 32  ;;  %v646_v0 = vmov (!%p525_p4), 0.0  }
   0xf   : > { %s563_s12 = sshll.u32 %s134_s11, 4  ;;  %s524_s13 = sshll.u32 %s134_s11, 2  ;;  %147 = vst [vmem:[#allocation2] sm:$0xff] (!%p525_p4), %v646_v0  ;;  %148 = vst [vmem:[#allocation3] sm:$0xff] (!%p525_p4), %v646_v0 }
  0x10   : > { %s674_s16 = scalar_lea.vmem %s783_s0, %s563_s12  ;;  %s679_s19 = scalar_lea.vmem %s785_s2, %s524_s13 }
  0x15 PF: > { %v574_v1 = vld [vmem:[%s784_s1 + $0x4] ss:$16 sps:$4 sm:$0xff]   ;;  %v576_v2 = vld [vmem:[%s784_s1] ss:$16 sps:$4 sm:$0xff]   ;;  %v647_v3 = vmov 0   ;;  %v150_v40 = vld [vmem:[%s674_s16 + $0x8] sm:$0xff] }
  0x16   : > { %381 = vmatprep.mubr.bf16.mxu0 %v647_v3  ;;  %422 = vmatprep.mubr.bf16.mxu1 %v647_v3  ;;  %v577_v4 = vld [vmem:[%s784_s1 + $0x24] ss:$16 sps:$4 sm:$0xff]   ;;  %v579_v5 = vld [vmem:[%s784_s1 + $0x20] ss:$16 sps:$4 sm:$0xff]   ;;  %v585_v7 = vld [vmem:[%s784_s1 + $0xc] ss:$16 sps:$4 sm:$0xff]   ;;  %v154_v47 = vunpack.c.h.bf16 %v150_v40  ;;  %v153_v53 = vunpack.c.l.bf16 %v150_v40 }
  0x17   : > { %349 = vmatprep.subr.bf16.mxu0 %v574_v1  ;;  %v580_v6 = vld [vmem:[%s784_s1 + $0x44] ss:$16 sps:$4 sm:$0xff]   ;;  %v588_v8 = vld [vmem:[%s784_s1 + $0x8] ss:$16 sps:$4 sm:$0xff]   ;;  %v582_v9 = vld [vmem:[%s784_s1 + $0x40] ss:$16 sps:$4 sm:$0xff]   ;;  %390 = vmatprep.subr.bf16.mxu1 %v585_v7 }
  0x18   : > { %350 = vmatpush1.bf16.msra.mxu0 %v576_v2  ;;  %v583_v10 = vld [vmem:[%s784_s1 + $0x64] ss:$16 sps:$4 sm:$0xff]   ;;  %391 = vmatpush1.bf16.msra.mxu1 %v588_v8  ;;  %v591_v11 = vld [vmem:[%s784_s1 + $0x2c] ss:$16 sps:$4 sm:$0xff]   ;;  %v594_v12 = vld [vmem:[%s784_s1 + $0x28] ss:$16 sps:$4 sm:$0xff]  }
  0x19   : > { %351 = vmatprep.subr.bf16.mxu0 %v577_v4  ;;  %392 = vmatprep.subr.bf16.mxu1 %v591_v11  ;;  %v587_v13 = vld [vmem:[%s784_s1 + $0x60] ss:$16 sps:$4 sm:$0xff]   ;;  %v589_v14 = vld [vmem:[%s784_s1 + $0x84] ss:$16 sps:$4 sm:$0xff]   ;;  %v597_v15 = vld [vmem:[%s784_s1 + $0x4c] ss:$16 sps:$4 sm:$0xff]  }
  0x1a   : > { %v600_v16 = vld [vmem:[%s784_s1 + $0x48] ss:$16 sps:$4 sm:$0xff]   ;;  %v603_v17 = vld [vmem:[%s784_s1 + $0x6c] ss:$16 sps:$4 sm:$0xff]   ;;  %v593_v18 = vld [vmem:[%s784_s1 + $0x80] ss:$16 sps:$4 sm:$0xff]  }
  0x1b   : > { %v595_v19 = vld [vmem:[%s784_s1 + $0xa4] ss:$16 sps:$4 sm:$0xff]   ;;  %v606_v20 = vld [vmem:[%s784_s1 + $0x68] ss:$16 sps:$4 sm:$0xff]   ;;  %v609_v21 = vld [vmem:[%s784_s1 + $0x8c] ss:$16 sps:$4 sm:$0xff]  }
  0x1c   : > { %352 = vmatpush1.bf16.msra.mxu0 %v579_v5  ;;  %393 = vmatpush1.bf16.msra.mxu1 %v594_v12  ;;  %v599_v22 = vld [vmem:[%s784_s1 + $0xa0] ss:$16 sps:$4 sm:$0xff]   ;;  %v601_v23 = vld [vmem:[%s784_s1 + $0xc4] ss:$16 sps:$4 sm:$0xff]   ;;  %v612_v24 = vld [vmem:[%s784_s1 + $0x88] ss:$16 sps:$4 sm:$0xff]  }
  0x1d   : > { %353 = vmatprep.subr.bf16.mxu0 %v580_v6  ;;  %394 = vmatprep.subr.bf16.mxu1 %v597_v15  ;;  %v613_v25 = vld [vmem:[%s784_s1 + $0xac] ss:$16 sps:$4 sm:$0xff]   ;;  %v605_v26 = vld [vmem:[%s784_s1 + $0xc0] ss:$16 sps:$4 sm:$0xff]   ;;  %v607_v27 = vld [vmem:[%s784_s1 + $0xe4] ss:$16 sps:$4 sm:$0xff]  }
  0x1e   : > { %v615_v28 = vld [vmem:[%s784_s1 + $0xa8] ss:$16 sps:$4 sm:$0xff]   ;;  %v616_v29 = vld [vmem:[%s784_s1 + $0xcc] ss:$16 sps:$4 sm:$0xff]   ;;  %v611_v30 = vld [vmem:[%s784_s1 + $0xe0] ss:$16 sps:$4 sm:$0xff]  }
  0x1f   : > { %v155_v31 = vld [vmem:[#allocation2] sm:$0xff]  ;;  %v618_v32 = vld [vmem:[%s784_s1 + $0xc8] ss:$16 sps:$4 sm:$0xff]   ;;  %v619_v33 = vld [vmem:[%s784_s1 + $0xec] ss:$16 sps:$4 sm:$0xff]  }
  0x20   : > { %354 = vmatpush1.bf16.msra.mxu0 %v582_v9  ;;  %395 = vmatpush1.bf16.msra.mxu1 %v600_v16  ;;  %v156_v34 = vpack.c.bf16 %v155_v31, %v155_v31  ;;  %v621_v35 = vld [vmem:[%s784_s1 + $0xe8] ss:$16 sps:$4 sm:$0xff]   ;;  %v149_v36 = vld [vmem:[%s674_s16] sm:$0xff] }
  0x21   : > { %355 = vmatprep.subr.bf16.mxu0 %v583_v10  ;;  %396 = vmatprep.subr.bf16.mxu1 %v603_v17  ;;  %v151_v37 = vunpack.c.l.bf16 %v149_v36  ;;  %v152_v38 = vunpack.c.h.bf16 %v149_v36  ;;  %v454_v63 = vld [vmem:[#allocation3] sm:$0xff] }
  0x24   : > { %356 = vmatpush1.bf16.msra.mxu0 %v587_v13  ;;  %397 = vmatpush1.bf16.msra.mxu1 %v606_v20 }
  0x25   : > { %357 = vmatprep.subr.bf16.mxu0 %v589_v14  ;;  %398 = vmatprep.subr.bf16.mxu1 %v609_v21 }
  0x28   : > { %358 = vmatpush1.bf16.msra.mxu0 %v593_v18  ;;  %399 = vmatpush1.bf16.msra.mxu1 %v612_v24 }
  0x29   : > { %359 = vmatprep.subr.bf16.mxu0 %v595_v19  ;;  %400 = vmatprep.subr.bf16.mxu1 %v613_v25 }
  0x2c   : > { %360 = vmatpush1.bf16.msra.mxu0 %v599_v22  ;;  %401 = vmatpush1.bf16.msra.mxu1 %v615_v28 }
  0x2d   : > { %361 = vmatprep.subr.bf16.mxu0 %v601_v23  ;;  %402 = vmatprep.subr.bf16.mxu1 %v616_v29 }
  0x30   : > { %362 = vmatpush1.bf16.msra.mxu0 %v605_v26  ;;  %403 = vmatpush1.bf16.msra.mxu1 %v618_v32 }
  0x31   : > { %363 = vmatprep.subr.bf16.mxu0 %v607_v27  ;;  %404 = vmatprep.subr.bf16.mxu1 %v619_v33 }
  0x34   : > { %364 = vmatpush1.bf16.msra.mxu0 %v611_v30  ;;  %405 = vmatpush1.bf16.msra.mxu1 %v621_v35 }
  0x37   : > { %382 = vmatmul.mubr.bf16.vlgmr.msra.gmra.mrb[0].mxu0 %v156_v34  ;;  %423 = vmatmul.mubr.bf16.vlgmr.msra.gmra.mrb[0].mxu1 %v156_v34 }
 0x10a   : > { %v383_v39 = vpop.f32.mrb[0].mxu0  ;;  %v424_v49 = vpop.f32.mrb[0].mxu1 }
 0x10b   : > { %v431_v41 = vadd.f32 %v383_v39, %v151_v37  ;;  %v385_v42 = vpop.f32.mrb[1].mxu0  ;;  %v426_v50 = vpop.f32.mrb[1].mxu1  ;;  %v433_v56 = vadd.f32 %v424_v49, %v153_v53 }
 0x10c   : > { %v432_v43 = vadd.f32 %v385_v42, %v152_v38  ;;  %v387_v44 = vpop.f32.mrb[2].mxu0  ;;  %v434_v51 = vadd.f32 %v426_v50, %v154_v47  ;;  %v428_v52 = vpop.f32.mrb[2].mxu1 }
 0x10d   : > { %v558_v45 = vmul.f32 -1.442695, %v431_v41  ;;  %v388_v46 = vpop.f32.mrb[3].mxu0  ;;  %v429_v54 = vpop.f32.mrb[3].mxu1 }
 0x10e   : > { %v559_v48 = vmul.f32 -1.442695, %v432_v43  ;;  %v560_v55 = vmul.f32 -1.442695, %v434_v51 }
 0x10f   : > { %622 = vpow2.f32 %v558_v45 }
 0x110   : > { %624 = vpow2.f32 %v559_v48 }
 0x111   : > { %626 = vpow2.f32 %v560_v55 }
 0x112   : > { %628 = vtanh.f32 %v433_v56 }
 0x119   : > { %v623_v57 = vpop.eup %622 }
 0x11a   : > { %v625_v58 = vpop.eup %624  ;;  %v438_v59 = vadd.f32 1.0, %v623_v57 }
 0x11b   : > { %v444_v60 = vadd.f32 1.0, %v625_v58  ;;  %v627_v61 = vpop.eup %626 }
 0x11c   : > { %630 = vrcp.f32 %v438_v59  ;;  %v629_v62 = vpop.eup %628  ;;  %v451_v1 = vadd.f32 1.0, %v627_v61 }
 0x11d   : > { %632 = vrcp.f32 %v444_v60 }
 0x11e   : > { %634 = vrcp.f32 %v451_v1 }
 0x126   : > { %v631_v0 = vpop.eup %630 }
 0x127   : > { %v633_v2 = vpop.eup %632  ;;  %v456_v3 = vmul.f32 %v631_v0, %v629_v62 }
 0x128   : > { %v455_v4 = vmul.f32 %v633_v2, %v454_v63  ;;  %v635_v6 = vpop.eup %634 }
 0x12a   : > { %v457_v5 = vadd.f32 %v456_v3, %v455_v4 }
 0x12c   : > { %636 = vtanh.f32 %v457_v5  ;;  %460 = vst [vmem:[#allocation3] sm:$0xff] %v457_v5 }
 0x136   : > { %v637_v7 = vpop.eup %636 }
 0x137   : > { %v459_v8 = vmul.f32 %v637_v7, %v635_v6 }
 0x139   : > { %461 = vst [vmem:[#allocation2] sm:$0xff] %v459_v8  ;;  %v462_v9 = vpack.c.bf16 %v459_v8, %v459_v8 }
 0x13b   : > { %463 = vst [vmem:[%s679_s19] sm:$0xf] %v462_v9 }
 0x13c PF: > { %s12_s9 = sadd.s32 1, %s644_s9  }
 0x13d   : > { %p9_p5 = scmp.ge.s32.totalorder %s12_s9, 11  }
 0x13f   :  { %11 = sbr.rel (!%p9_p5) target bundleno = 1 (0x1), region = 62 }

// kernel: decoder_rnn_forward.7
= control target key start
LH: loop header
LB: loop body
LE: loop exit
PB: predicated region body
PF: predicated region fallthrough
CT: control target
= control target key end

     0   :  { %v689_v1 = vmov 0   ;;  %v58_v38 = vlaneseq  ;;  %s932_s1 = inlined_call_operand.vmem [shape: bf16[128,512], index: 1, kind: input, shape index: {}]   ;;  %s933_s0 = inlined_call_operand.vmem [shape: bf16[72,128], index: 0, kind: input, shape index: {}]   ;;  %s934_s2 = inlined_call_operand.vmem [shape: f32[1,512], index: 2, kind: input, shape index: {}]   ;;  %s935_s3 = inlined_call_operand.vmem [shape: bf16[72,512], index: 3, kind: output, shape index: {}]  }
   0x1   :  { %v636_v0 = vld [vmem:[%s932_s1 + $0x4] ss:$16 sps:$4 sm:$0xff]   ;;  %298 = vmatprep.mubr.bf16.mxu0 %v689_v1  ;;  %379 = vmatprep.mubr.bf16.mxu1 %v689_v1  ;;  %v638_v2 = vld [vmem:[%s932_s1 + $0xc] ss:$16 sps:$4 sm:$0xff]   ;;  %v640_v3 = vld [vmem:[%s932_s1] ss:$16 sps:$4 sm:$0xff]  }
   0x2   :  { %266 = vmatprep.subr.bf16.mxu0 %v636_v0  ;;  %v641_v4 = vld [vmem:[%s932_s1 + $0x8] ss:$16 sps:$4 sm:$0xff]   ;;  %347 = vmatprep.subr.bf16.mxu1 %v638_v2  ;;  %v642_v5 = vld [vmem:[%s932_s1 + $0x24] ss:$16 sps:$4 sm:$0xff]   ;;  %v644_v6 = vld [vmem:[%s932_s1 + $0x2c] ss:$16 sps:$4 sm:$0xff]  }
   0x3   :  { %267 = vmatpush1.bf16.msra.mxu0 %v640_v3  ;;  %348 = vmatpush1.bf16.msra.mxu1 %v641_v4  ;;  %v646_v7 = vld [vmem:[%s932_s1 + $0x20] ss:$16 sps:$4 sm:$0xff]   ;;  %v647_v8 = vld [vmem:[%s932_s1 + $0x28] ss:$16 sps:$4 sm:$0xff]   ;;  %v648_v9 = vld [vmem:[%s932_s1 + $0x44] ss:$16 sps:$4 sm:$0xff]  }
   0x4   :  { %268 = vmatprep.subr.bf16.mxu0 %v642_v5  ;;  %349 = vmatprep.subr.bf16.mxu1 %v644_v6  ;;  %v650_v10 = vld [vmem:[%s932_s1 + $0x4c] ss:$16 sps:$4 sm:$0xff]   ;;  %v652_v11 = vld [vmem:[%s932_s1 + $0x40] ss:$16 sps:$4 sm:$0xff]   ;;  %v653_v12 = vld [vmem:[%s932_s1 + $0x48] ss:$16 sps:$4 sm:$0xff]  }
   0x5   :  { %v654_v13 = vld [vmem:[%s932_s1 + $0x64] ss:$16 sps:$4 sm:$0xff]   ;;  %v656_v14 = vld [vmem:[%s932_s1 + $0x6c] ss:$16 sps:$4 sm:$0xff]   ;;  %v658_v15 = vld [vmem:[%s932_s1 + $0x60] ss:$16 sps:$4 sm:$0xff]  }
   0x6   :  { %v659_v16 = vld [vmem:[%s932_s1 + $0x68] ss:$16 sps:$4 sm:$0xff]   ;;  %v660_v17 = vld [vmem:[%s932_s1 + $0x84] ss:$16 sps:$4 sm:$0xff]   ;;  %v662_v18 = vld [vmem:[%s932_s1 + $0x8c] ss:$16 sps:$4 sm:$0xff]  }
   0x7   :  { %269 = vmatpush1.bf16.msra.mxu0 %v646_v7  ;;  %350 = vmatpush1.bf16.msra.mxu1 %v647_v8  ;;  %v664_v19 = vld [vmem:[%s932_s1 + $0x80] ss:$16 sps:$4 sm:$0xff]   ;;  %v665_v20 = vld [vmem:[%s932_s1 + $0x88] ss:$16 sps:$4 sm:$0xff]   ;;  %v666_v21 = vld [vmem:[%s932_s1 + $0xa4] ss:$16 sps:$4 sm:$0xff]  }
   0x8   :  { %270 = vmatprep.subr.bf16.mxu0 %v648_v9  ;;  %351 = vmatprep.subr.bf16.mxu1 %v650_v10  ;;  %v668_v22 = vld [vmem:[%s932_s1 + $0xac] ss:$16 sps:$4 sm:$0xff]   ;;  %v670_v23 = vld [vmem:[%s932_s1 + $0xa0] ss:$16 sps:$4 sm:$0xff]   ;;  %v671_v24 = vld [vmem:[%s932_s1 + $0xa8] ss:$16 sps:$4 sm:$0xff]  }
   0x9   :  { %v672_v25 = vld [vmem:[%s932_s1 + $0xc4] ss:$16 sps:$4 sm:$0xff]   ;;  %v674_v26 = vld [vmem:[%s932_s1 + $0xcc] ss:$16 sps:$4 sm:$0xff]   ;;  %v676_v27 = vld [vmem:[%s932_s1 + $0xc0] ss:$16 sps:$4 sm:$0xff]  }
   0xa   :  { %v677_v28 = vld [vmem:[%s932_s1 + $0xc8] ss:$16 sps:$4 sm:$0xff]   ;;  %v678_v29 = vld [vmem:[%s932_s1 + $0xe4] ss:$16 sps:$4 sm:$0xff]   ;;  %v680_v30 = vld [vmem:[%s932_s1 + $0xec] ss:$16 sps:$4 sm:$0xff]  }
   0xb   :  { %271 = vmatpush1.bf16.msra.mxu0 %v652_v11  ;;  %352 = vmatpush1.bf16.msra.mxu1 %v653_v12  ;;  %v682_v31 = vld [vmem:[%s932_s1 + $0xe0] ss:$16 sps:$4 sm:$0xff]   ;;  %v683_v32 = vld [vmem:[%s932_s1 + $0xe8] ss:$16 sps:$4 sm:$0xff]   ;;  %v59_v39 = vshrl.u32 %v58_v38, 7 }
   0xc   :  { %272 = vmatprep.subr.bf16.mxu0 %v654_v13  ;;  %353 = vmatprep.subr.bf16.mxu1 %v656_v14  ;;  %v684_v33 = vld [vmem:[%s933_s0] sm:$0xff]   ;;  %v685_v34 = vld [vmem:[%s933_s0 + $0x8] sm:$0xff]   ;;  %v686_v35 = vld [vmem:[%s933_s0 + $0x10] sm:$0xff]  }
   0xd   :  { %v687_v36 = vld [vmem:[%s933_s0 + $0x18] sm:$0xff]   ;;  %v688_v37 = vld [vmem:[%s933_s0 + $0x20] ss:$0 sps:$4 sm:$0xff]   ;;  %v60_v40 = vsub.s32 0, %v59_v39  ;;  %v68_v41 = vsub.s32 2, %v59_v39  ;;  %v64_v43 = vsub.s32 1, %v59_v39 }
   0xe   :  { %v56_v42 = vld [vmem:[%s934_s2] sm:$0xf]  ;;  %v72_v44 = vsub.s32 3, %v59_v39 }
   0xf   :  { %273 = vmatpush1.bf16.msra.mxu0 %v658_v15  ;;  %354 = vmatpush1.bf16.msra.mxu1 %v659_v16  ;;  %v834_v45 = vrot.slane %v56_v42, %v60_v40  ;;  %v836_v46 = vrot.slane %v56_v42, %v68_v41  ;;  %v838_v47 = vrot.slane %v56_v42, %v64_v43 }
  0x10   :  { %274 = vmatprep.subr.bf16.mxu0 %v660_v17  ;;  %355 = vmatprep.subr.bf16.mxu1 %v662_v18  ;;  %v840_v48 = vrot.slane %v56_v42, %v72_v44 }
  0x13   :  { %275 = vmatpush1.bf16.msra.mxu0 %v664_v19  ;;  %356 = vmatpush1.bf16.msra.mxu1 %v665_v20 }
  0x14   :  { %276 = vmatprep.subr.bf16.mxu0 %v666_v21  ;;  %357 = vmatprep.subr.bf16.mxu1 %v668_v22 }
  0x17   :  { %277 = vmatpush1.bf16.msra.mxu0 %v670_v23  ;;  %358 = vmatpush1.bf16.msra.mxu1 %v671_v24 }
  0x18   :  { %278 = vmatprep.subr.bf16.mxu0 %v672_v25  ;;  %359 = vmatprep.subr.bf16.mxu1 %v674_v26 }
  0x1b   :  { %279 = vmatpush1.bf16.msra.mxu0 %v676_v27  ;;  %360 = vmatpush1.bf16.msra.mxu1 %v677_v28 }
  0x1c   :  { %280 = vmatprep.subr.bf16.mxu0 %v678_v29  ;;  %361 = vmatprep.subr.bf16.mxu1 %v680_v30 }
  0x1f   :  { %281 = vmatpush1.bf16.msra.mxu0 %v682_v31  ;;  %362 = vmatpush1.bf16.msra.mxu1 %v683_v32 }
  0x22   :  { %299 = vmatmul.mubr.bf16.vlgmr.msra.gmra.mrb[0].mxu0 %v684_v33  ;;  %380 = vmatmul.mubr.bf16.vlgmr.msra.gmra.mrb[0].mxu1 %v684_v33 }
  0x23   :  { %308 = vmatprep.mubr.bf16.mxu0 %v689_v1  ;;  %389 = vmatprep.mubr.bf16.mxu1 %v689_v1 }
  0x2a   :  { %309 = vmatmul.mubr.bf16.gmra.mrb[4].mxu0 %v685_v34  ;;  %390 = vmatmul.mubr.bf16.gmra.mrb[4].mxu1 %v685_v34 }
  0x2b   :  { %318 = vmatprep.mubr.bf16.mxu0 %v689_v1  ;;  %399 = vmatprep.mubr.bf16.mxu1 %v689_v1 }
  0x32   :  { %319 = vmatmul.mubr.bf16.gmra.mrb[8].mxu0 %v686_v35  ;;  %400 = vmatmul.mubr.bf16.gmra.mrb[8].mxu1 %v686_v35 }
  0x33   :  { %328 = vmatprep.mubr.bf16.mxu0 %v689_v1  ;;  %409 = vmatprep.mubr.bf16.mxu1 %v689_v1 }
  0x3a   :  { %329 = vmatmul.mubr.bf16.gmra.mrb[12].mxu0 %v687_v36  ;;  %410 = vmatmul.mubr.bf16.gmra.mrb[12].mxu1 %v687_v36 }
  0x3b   :  { %338 = vmatprep.mubr.bf16.mxu0 %v689_v1  ;;  %419 = vmatprep.mubr.bf16.mxu1 %v689_v1 }
  0x42   :  { %339 = vmatmul.mubr.bf16.gmra.mrb[16].mxu0 %v688_v37  ;;  %420 = vmatmul.mubr.bf16.gmra.mrb[16].mxu1 %v688_v37 }
  0xf5   :  { %v300_v49 = vpop.f32.mrb[0].mxu0  ;;  %v381_v50 = vpop.f32.mrb[0].mxu1 }
  0xf6   :  { %v301_v51 = vadd.f32 %v300_v49, %v834_v45  ;;  %v382_v52 = vadd.f32 %v381_v50, %v836_v46  ;;  %v302_v53 = vpop.f32.mrb[1].mxu0  ;;  %v383_v54 = vpop.f32.mrb[1].mxu1 }
  0xf7   :  { %v303_v55 = vadd.f32 %v302_v53, %v838_v47  ;;  %v384_v56 = vadd.f32 %v383_v54, %v840_v48  ;;  %v304_v57 = vpop.f32.mrb[2].mxu0  ;;  %v385_v58 = vpop.f32.mrb[2].mxu1 }
  0xf8   :  { %v305_v59 = vadd.f32 %v304_v57, %v834_v45  ;;  %v386_v60 = vadd.f32 %v385_v58, %v836_v46  ;;  %v306_v61 = vpop.f32.mrb[3].mxu0  ;;  %v387_v62 = vpop.f32.mrb[3].mxu1 }
  0xf9   :  { %v617_v63 = vpack.c.bf16 %v303_v55, %v301_v51  ;;  %v618_v0 = vpack.c.bf16 %v384_v56, %v382_v52  ;;  %v307_v1 = vadd.f32 %v306_v61, %v838_v47  ;;  %v388_v2 = vadd.f32 %v387_v62, %v840_v48 }
  0xfb   :  { %540 = vst [vmem:[%s935_s3] sm:$0xff] %v617_v63  ;;  %541 = vst [vmem:[%s935_s3 + $0x8] sm:$0xff] %v618_v0  ;;  %v619_v3 = vpack.c.bf16 %v307_v1, %v305_v59  ;;  %v620_v4 = vpack.c.bf16 %v388_v2, %v386_v60 }
  0xfd   :  { %542 = vst [vmem:[%s935_s3 + $0x10] sm:$0xff] %v619_v3  ;;  %543 = vst [vmem:[%s935_s3 + $0x18] sm:$0xff] %v620_v4  ;;  %v310_v5 = vpop.f32.mrb[4].mxu0  ;;  %v391_v6 = vpop.f32.mrb[4].mxu1 }
  0xfe   :  { %v311_v7 = vadd.f32 %v310_v5, %v834_v45  ;;  %v392_v8 = vadd.f32 %v391_v6, %v836_v46  ;;  %v312_v9 = vpop.f32.mrb[5].mxu0  ;;  %v393_v10 = vpop.f32.mrb[5].mxu1 }
  0xff   :  { %v313_v11 = vadd.f32 %v312_v9, %v838_v47  ;;  %v394_v12 = vadd.f32 %v393_v10, %v840_v48  ;;  %v314_v13 = vpop.f32.mrb[6].mxu0  ;;  %v395_v14 = vpop.f32.mrb[6].mxu1 }
 0x100   :  { %v315_v15 = vadd.f32 %v314_v13, %v834_v45  ;;  %v396_v16 = vadd.f32 %v395_v14, %v836_v46  ;;  %v316_v17 = vpop.f32.mrb[7].mxu0  ;;  %v397_v18 = vpop.f32.mrb[7].mxu1 }
 0x101   :  { %v621_v19 = vpack.c.bf16 %v313_v11, %v311_v7  ;;  %v622_v20 = vpack.c.bf16 %v394_v12, %v392_v8  ;;  %v317_v21 = vadd.f32 %v316_v17, %v838_v47  ;;  %v398_v22 = vadd.f32 %v397_v18, %v840_v48 }
 0x103   :  { %544 = vst [vmem:[%s935_s3 + $0x20] sm:$0xff] %v621_v19  ;;  %545 = vst [vmem:[%s935_s3 + $0x28] sm:$0xff] %v622_v20  ;;  %v623_v23 = vpack.c.bf16 %v317_v21, %v315_v15  ;;  %v624_v24 = vpack.c.bf16 %v398_v22, %v396_v16 }
 0x105   :  { %546 = vst [vmem:[%s935_s3 + $0x30] sm:$0xff] %v623_v23  ;;  %547 = vst [vmem:[%s935_s3 + $0x38] sm:$0xff] %v624_v24  ;;  %v320_v25 = vpop.f32.mrb[8].mxu0  ;;  %v401_v26 = vpop.f32.mrb[8].mxu1 }
 0x106   :  { %v321_v27 = vadd.f32 %v320_v25, %v834_v45  ;;  %v402_v28 = vadd.f32 %v401_v26, %v836_v46  ;;  %v322_v29 = vpop.f32.mrb[9].mxu0  ;;  %v403_v30 = vpop.f32.mrb[9].mxu1 }
 0x107   :  { %v323_v31 = vadd.f32 %v322_v29, %v838_v47  ;;  %v404_v32 = vadd.f32 %v403_v30, %v840_v48  ;;  %v324_v33 = vpop.f32.mrb[10].mxu0  ;;  %v405_v34 = vpop.f32.mrb[10].mxu1 }
 0x108   :  { %v325_v35 = vadd.f32 %v324_v33, %v834_v45  ;;  %v406_v36 = vadd.f32 %v405_v34, %v836_v46  ;;  %v326_v37 = vpop.f32.mrb[11].mxu0  ;;  %v407_v38 = vpop.f32.mrb[11].mxu1 }
 0x109   :  { %v625_v39 = vpack.c.bf16 %v323_v31, %v321_v27  ;;  %v626_v40 = vpack.c.bf16 %v404_v32, %v402_v28  ;;  %v327_v41 = vadd.f32 %v326_v37, %v838_v47  ;;  %v408_v42 = vadd.f32 %v407_v38, %v840_v48 }
 0x10b   :  { %548 = vst [vmem:[%s935_s3 + $0x40] sm:$0xff] %v625_v39  ;;  %549 = vst [vmem:[%s935_s3 + $0x48] sm:$0xff] %v626_v40  ;;  %v627_v43 = vpack.c.bf16 %v327_v41, %v325_v35  ;;  %v628_v44 = vpack.c.bf16 %v408_v42, %v406_v36 }
 0x10d   :  { %550 = vst [vmem:[%s935_s3 + $0x50] sm:$0xff] %v627_v43  ;;  %551 = vst [vmem:[%s935_s3 + $0x58] sm:$0xff] %v628_v44  ;;  %v330_v49 = vpop.f32.mrb[12].mxu0  ;;  %v411_v50 = vpop.f32.mrb[12].mxu1 }
 0x10e   :  { %v331_v51 = vadd.f32 %v330_v49, %v834_v45  ;;  %v412_v52 = vadd.f32 %v411_v50, %v836_v46  ;;  %v332_v53 = vpop.f32.mrb[13].mxu0  ;;  %v413_v54 = vpop.f32.mrb[13].mxu1 }
 0x10f   :  { %v333_v55 = vadd.f32 %v332_v53, %v838_v47  ;;  %v414_v56 = vadd.f32 %v413_v54, %v840_v48  ;;  %v334_v57 = vpop.f32.mrb[14].mxu0  ;;  %v415_v58 = vpop.f32.mrb[14].mxu1 }
 0x110   :  { %v335_v59 = vadd.f32 %v334_v57, %v834_v45  ;;  %v416_v60 = vadd.f32 %v415_v58, %v836_v46  ;;  %v336_v61 = vpop.f32.mrb[15].mxu0  ;;  %v417_v62 = vpop.f32.mrb[15].mxu1 }
 0x111   :  { %v629_v63 = vpack.c.bf16 %v333_v55, %v331_v51  ;;  %v630_v0 = vpack.c.bf16 %v414_v56, %v412_v52  ;;  %v337_v1 = vadd.f32 %v336_v61, %v838_v47  ;;  %v418_v2 = vadd.f32 %v417_v62, %v840_v48 }
 0x113   :  { %552 = vst [vmem:[%s935_s3 + $0x60] sm:$0xff] %v629_v63  ;;  %553 = vst [vmem:[%s935_s3 + $0x68] sm:$0xff] %v630_v0  ;;  %v631_v3 = vpack.c.bf16 %v337_v1, %v335_v59  ;;  %v632_v4 = vpack.c.bf16 %v418_v2, %v416_v60 }
 0x115   :  { %554 = vst [vmem:[%s935_s3 + $0x70] sm:$0xff] %v631_v3  ;;  %555 = vst [vmem:[%s935_s3 + $0x78] sm:$0xff] %v632_v4  ;;  %v340_v5 = vpop.f32.mrb[16].mxu0  ;;  %v421_v6 = vpop.f32.mrb[16].mxu1 }
 0x116   :  { %v341_v7 = vadd.f32 %v340_v5, %v834_v45  ;;  %v422_v8 = vadd.f32 %v421_v6, %v836_v46  ;;  %v342_v9 = vpop.f32.mrb[17].mxu0  ;;  %v423_v10 = vpop.f32.mrb[17].mxu1 }
 0x117   :  { %v343_v11 = vadd.f32 %v342_v9, %v838_v47  ;;  %v424_v12 = vadd.f32 %v423_v10, %v840_v48  ;;  %v344_v13 = vpop.f32.mrb[18].mxu0  ;;  %v425_v14 = vpop.f32.mrb[18].mxu1 }
 0x118   :  { %v345_v15 = vpop.f32.mrb[19].mxu0  ;;  %v426_v16 = vpop.f32.mrb[19].mxu1 }
 0x119   :  { %v633_v17 = vpack.c.bf16 %v343_v11, %v341_v7  ;;  %v634_v18 = vpack.c.bf16 %v424_v12, %v422_v8 }
 0x11b   :  { %556 = vst [vmem:[%s935_s3 + $0x80] sm:$0xff] %v633_v17  ;;  %557 = vst [vmem:[%s935_s3 + $0x88] sm:$0xff] %v634_v18 }

// kernel: decoder_rnn_forward.5
= control target key start
LH: loop header
LB: loop body
LE: loop exit
PB: predicated region body
PF: predicated region fallthrough
CT: control target
= control target key end

     0   :  { %8 = vsyncpa [#allocation3], 0  ;;  %s731_s12 = smov [#allocation2]   ;;  %s893_s0 = inlined_call_operand.vmem [shape: bf16[72,128], index: 0, kind: input, shape index: {}]   ;;  %s894_s1 = inlined_call_operand.hbm [shape: bf16[128,512], index: 1, kind: input, shape index: {}]   ;;  %s895_s2 = inlined_call_operand.vmem [shape: f32[1,512], index: 2, kind: input, shape index: {}]   ;;  %s896_s3 = inlined_call_operand.vmem [shape: bf16[72,512], index: 3, kind: output, shape index: {}]  }
   0x1   :  { %s16_s13 = sshll.u32 %s731_s12, 4  ;;  %s707_s16 = scalar_lea.hbm %s894_s1, 4096  ;;  %s17_s13 = int_to_ptr.vmem [resolvable:$true] %s16_s13 }
   0x2   :  { %p708_p0 = scmp.ne.s32.totalorder %s894_s1, %s707_s16  ;;  %p711_p1 = scmp.lt.u32.totalorder %s707_s16, %s894_s1 }
   0x4   :  { %p713_p2 = pnand %p711_p1, %p708_p0 }
   0x6   :  { %716 = shalt.err (!%p713_p2)
}
   0x7   :  { %s717_s21 = scalar_lea.vmem %s17_s13, 4096  ;;  %p722_p4 = scmp.lt.s32.totalorder %s17_s13, %s17_s13 }
   0x8   :  { %p718_p3 = scmp.ne.s32.totalorder %s17_s13, %s717_s21  ;;  %p723_p5 = scmp.lt.s32.totalorder %s717_s21, %s717_s21 }
   0xa   :  { %p724_p6 = por %p723_p5, %p722_p4 }
   0xc   :  { %p725_p7 = pnand %p724_p6, %p718_p3 }
   0xe   :  { %728 = shalt.err (!%p725_p7)
}
   0xf   :  { %s732_s22 = smov 256   ;;  %s733_s23 = smov 16  }
  0x10   :  { %22 = dma.hbm_to_vmem [thread:$0]  %s894_s1, 4096, %s17_s13, [#allocation3], %s732_s22, %s732_s22, %s733_s23  }
  0x11   :  { %729 = dma.done.wait [#allocation3], 4096  }
  0x12   :  { %730 = vsyncadd [#allocation3], 4294963200  ;;  %v734_v0 = vmov 0   ;;  %v654_v1 = vld [vmem:[#allocation2 + $0x4] ss:$16 sps:$4 sm:$0xff]   ;;  %v703_v34 = vld [vmem:[%s893_s0 + $0x8] sm:$0xff]   ;;  %v72_v38 = vlaneseq }
  0x13   :  { %312 = vmatprep.mubr.bf16.mxu0 %v734_v0  ;;  %393 = vmatprep.mubr.bf16.mxu1 %v734_v0  ;;  %v656_v2 = vld [vmem:[#allocation2 + $0xc] ss:$16 sps:$4 sm:$0xff]   ;;  %v658_v3 = vld [vmem:[#allocation2] ss:$16 sps:$4 sm:$0xff]   ;;  %v659_v4 = vld [vmem:[#allocation2 + $0x8] ss:$16 sps:$4 sm:$0xff]  }
  0x14   :  { %280 = vmatprep.subr.bf16.mxu0 %v654_v1  ;;  %361 = vmatprep.subr.bf16.mxu1 %v656_v2  ;;  %v660_v5 = vld [vmem:[#allocation2 + $0x24] ss:$16 sps:$4 sm:$0xff]   ;;  %v662_v6 = vld [vmem:[#allocation2 + $0x2c] ss:$16 sps:$4 sm:$0xff]   ;;  %v664_v7 = vld [vmem:[#allocation2 + $0x20] ss:$16 sps:$4 sm:$0xff]  }
  0x15   :  { %281 = vmatpush1.bf16.msra.mxu0 %v658_v3  ;;  %362 = vmatpush1.bf16.msra.mxu1 %v659_v4  ;;  %v665_v8 = vld [vmem:[#allocation2 + $0x28] ss:$16 sps:$4 sm:$0xff]   ;;  %v666_v9 = vld [vmem:[#allocation2 + $0x44] ss:$16 sps:$4 sm:$0xff]   ;;  %v668_v10 = vld [vmem:[#allocation2 + $0x4c] ss:$16 sps:$4 sm:$0xff]  }
  0x16   :  { %282 = vmatprep.subr.bf16.mxu0 %v660_v5  ;;  %363 = vmatprep.subr.bf16.mxu1 %v662_v6  ;;  %v670_v11 = vld [vmem:[#allocation2 + $0x40] ss:$16 sps:$4 sm:$0xff]   ;;  %v671_v12 = vld [vmem:[#allocation2 + $0x48] ss:$16 sps:$4 sm:$0xff]   ;;  %v672_v13 = vld [vmem:[#allocation2 + $0x64] ss:$16 sps:$4 sm:$0xff]  }
  0x17   :  { %v674_v14 = vld [vmem:[#allocation2 + $0x6c] ss:$16 sps:$4 sm:$0xff]   ;;  %v676_v15 = vld [vmem:[#allocation2 + $0x60] ss:$16 sps:$4 sm:$0xff]   ;;  %v677_v16 = vld [vmem:[#allocation2 + $0x68] ss:$16 sps:$4 sm:$0xff]  }
  0x18   :  { %v678_v17 = vld [vmem:[#allocation2 + $0x84] ss:$16 sps:$4 sm:$0xff]   ;;  %v680_v18 = vld [vmem:[#allocation2 + $0x8c] ss:$16 sps:$4 sm:$0xff]   ;;  %v682_v19 = vld [vmem:[#allocation2 + $0x80] ss:$16 sps:$4 sm:$0xff]  }
  0x19   :  { %283 = vmatpush1.bf16.msra.mxu0 %v664_v7  ;;  %364 = vmatpush1.bf16.msra.mxu1 %v665_v8  ;;  %v683_v20 = vld [vmem:[#allocation2 + $0x88] ss:$16 sps:$4 sm:$0xff]   ;;  %v684_v21 = vld [vmem:[#allocation2 + $0xa4] ss:$16 sps:$4 sm:$0xff]   ;;  %v686_v22 = vld [vmem:[#allocation2 + $0xac] ss:$16 sps:$4 sm:$0xff]  }
  0x1a   :  { %284 = vmatprep.subr.bf16.mxu0 %v666_v9  ;;  %365 = vmatprep.subr.bf16.mxu1 %v668_v10  ;;  %v688_v23 = vld [vmem:[#allocation2 + $0xa0] ss:$16 sps:$4 sm:$0xff]   ;;  %v689_v24 = vld [vmem:[#allocation2 + $0xa8] ss:$16 sps:$4 sm:$0xff]   ;;  %v690_v25 = vld [vmem:[#allocation2 + $0xc4] ss:$16 sps:$4 sm:$0xff]  }
  0x1b   :  { %v692_v26 = vld [vmem:[#allocation2 + $0xcc] ss:$16 sps:$4 sm:$0xff]   ;;  %v694_v27 = vld [vmem:[#allocation2 + $0xc0] ss:$16 sps:$4 sm:$0xff]   ;;  %v695_v28 = vld [vmem:[#allocation2 + $0xc8] ss:$16 sps:$4 sm:$0xff]  }
  0x1c   :  { %v696_v29 = vld [vmem:[#allocation2 + $0xe4] ss:$16 sps:$4 sm:$0xff]   ;;  %v698_v30 = vld [vmem:[#allocation2 + $0xec] ss:$16 sps:$4 sm:$0xff]   ;;  %v700_v31 = vld [vmem:[#allocation2 + $0xe0] ss:$16 sps:$4 sm:$0xff]  }
  0x1d   :  { %285 = vmatpush1.bf16.msra.mxu0 %v670_v11  ;;  %366 = vmatpush1.bf16.msra.mxu1 %v671_v12  ;;  %v701_v32 = vld [vmem:[#allocation2 + $0xe8] ss:$16 sps:$4 sm:$0xff]   ;;  %v702_v33 = vld [vmem:[%s893_s0] sm:$0xff]   ;;  %v704_v35 = vld [vmem:[%s893_s0 + $0x10] sm:$0xff]   ;;  %v73_v39 = vshrl.u32 %v72_v38, 7 }
  0x1e   :  { %286 = vmatprep.subr.bf16.mxu0 %v672_v13  ;;  %367 = vmatprep.subr.bf16.mxu1 %v674_v14  ;;  %v705_v36 = vld [vmem:[%s893_s0 + $0x18] sm:$0xff]   ;;  %v706_v37 = vld [vmem:[%s893_s0 + $0x20] ss:$0 sps:$4 sm:$0xff]  }
  0x1f   :  { %v74_v40 = vsub.s32 0, %v73_v39  ;;  %v82_v41 = vsub.s32 2, %v73_v39  ;;  %v70_v42 = vld [vmem:[%s895_s2] sm:$0xf]  ;;  %v78_v43 = vsub.s32 1, %v73_v39  ;;  %v86_v44 = vsub.s32 3, %v73_v39 }
  0x21   :  { %287 = vmatpush1.bf16.msra.mxu0 %v676_v15  ;;  %368 = vmatpush1.bf16.msra.mxu1 %v677_v16  ;;  %v795_v45 = vrot.slane %v70_v42, %v74_v40  ;;  %v797_v46 = vrot.slane %v70_v42, %v82_v41  ;;  %v799_v47 = vrot.slane %v70_v42, %v78_v43 }
  0x22   :  { %288 = vmatprep.subr.bf16.mxu0 %v678_v17  ;;  %369 = vmatprep.subr.bf16.mxu1 %v680_v18  ;;  %v801_v48 = vrot.slane %v70_v42, %v86_v44 }
  0x25   :  { %289 = vmatpush1.bf16.msra.mxu0 %v682_v19  ;;  %370 = vmatpush1.bf16.msra.mxu1 %v683_v20 }
  0x26   :  { %290 = vmatprep.subr.bf16.mxu0 %v684_v21  ;;  %371 = vmatprep.subr.bf16.mxu1 %v686_v22 }
  0x29   :  { %291 = vmatpush1.bf16.msra.mxu0 %v688_v23  ;;  %372 = vmatpush1.bf16.msra.mxu1 %v689_v24 }
  0x2a   :  { %292 = vmatprep.subr.bf16.mxu0 %v690_v25  ;;  %373 = vmatprep.subr.bf16.mxu1 %v692_v26 }
  0x2d   :  { %293 = vmatpush1.bf16.msra.mxu0 %v694_v27  ;;  %374 = vmatpush1.bf16.msra.mxu1 %v695_v28 }
  0x2e   :  { %294 = vmatprep.subr.bf16.mxu0 %v696_v29  ;;  %375 = vmatprep.subr.bf16.mxu1 %v698_v30 }
  0x31   :  { %295 = vmatpush1.bf16.msra.mxu0 %v700_v31  ;;  %376 = vmatpush1.bf16.msra.mxu1 %v701_v32 }
  0x34   :  { %313 = vmatmul.mubr.bf16.vlgmr.msra.gmra.mrb[0].mxu0 %v702_v33  ;;  %394 = vmatmul.mubr.bf16.vlgmr.msra.gmra.mrb[0].mxu1 %v702_v33 }
  0x35   :  { %322 = vmatprep.mubr.bf16.mxu0 %v734_v0  ;;  %403 = vmatprep.mubr.bf16.mxu1 %v734_v0 }
  0x3c   :  { %323 = vmatmul.mubr.bf16.gmra.mrb[4].mxu0 %v703_v34  ;;  %404 = vmatmul.mubr.bf16.gmra.mrb[4].mxu1 %v703_v34 }
  0x3d   :  { %332 = vmatprep.mubr.bf16.mxu0 %v734_v0  ;;  %413 = vmatprep.mubr.bf16.mxu1 %v734_v0 }
  0x44   :  { %333 = vmatmul.mubr.bf16.gmra.mrb[8].mxu0 %v704_v35  ;;  %414 = vmatmul.mubr.bf16.gmra.mrb[8].mxu1 %v704_v35 }
  0x45   :  { %342 = vmatprep.mubr.bf16.mxu0 %v734_v0  ;;  %423 = vmatprep.mubr.bf16.mxu1 %v734_v0 }
  0x4c   :  { %343 = vmatmul.mubr.bf16.gmra.mrb[12].mxu0 %v705_v36  ;;  %424 = vmatmul.mubr.bf16.gmra.mrb[12].mxu1 %v705_v36 }
  0x4d   :  { %352 = vmatprep.mubr.bf16.mxu0 %v734_v0  ;;  %433 = vmatprep.mubr.bf16.mxu1 %v734_v0 }
  0x54   :  { %353 = vmatmul.mubr.bf16.gmra.mrb[16].mxu0 %v706_v37  ;;  %434 = vmatmul.mubr.bf16.gmra.mrb[16].mxu1 %v706_v37 }
 0x107   :  { %v314_v49 = vpop.f32.mrb[0].mxu0  ;;  %v395_v50 = vpop.f32.mrb[0].mxu1 }
 0x108   :  { %v315_v51 = vadd.f32 %v314_v49, %v795_v45  ;;  %v396_v52 = vadd.f32 %v395_v50, %v797_v46  ;;  %v316_v53 = vpop.f32.mrb[1].mxu0  ;;  %v397_v54 = vpop.f32.mrb[1].mxu1 }
 0x109   :  { %v317_v55 = vadd.f32 %v316_v53, %v799_v47  ;;  %v398_v56 = vadd.f32 %v397_v54, %v801_v48  ;;  %v318_v57 = vpop.f32.mrb[2].mxu0  ;;  %v399_v58 = vpop.f32.mrb[2].mxu1 }
 0x10a   :  { %v319_v59 = vadd.f32 %v318_v57, %v795_v45  ;;  %v400_v60 = vadd.f32 %v399_v58, %v797_v46  ;;  %v320_v61 = vpop.f32.mrb[3].mxu0  ;;  %v401_v62 = vpop.f32.mrb[3].mxu1 }
 0x10b   :  { %v632_v63 = vpack.c.bf16 %v317_v55, %v315_v51  ;;  %v633_v0 = vpack.c.bf16 %v398_v56, %v396_v52  ;;  %v321_v1 = vadd.f32 %v320_v61, %v799_v47  ;;  %v402_v2 = vadd.f32 %v401_v62, %v801_v48 }
 0x10d   :  { %554 = vst [vmem:[%s896_s3] sm:$0xff] %v632_v63  ;;  %555 = vst [vmem:[%s896_s3 + $0x8] sm:$0xff] %v633_v0  ;;  %v634_v3 = vpack.c.bf16 %v321_v1, %v319_v59  ;;  %v635_v4 = vpack.c.bf16 %v402_v2, %v400_v60 }
 0x10f   :  { %556 = vst [vmem:[%s896_s3 + $0x10] sm:$0xff] %v634_v3  ;;  %557 = vst [vmem:[%s896_s3 + $0x18] sm:$0xff] %v635_v4  ;;  %v324_v5 = vpop.f32.mrb[4].mxu0  ;;  %v405_v6 = vpop.f32.mrb[4].mxu1 }
 0x110   :  { %v325_v7 = vadd.f32 %v324_v5, %v795_v45  ;;  %v406_v8 = vadd.f32 %v405_v6, %v797_v46  ;;  %v326_v9 = vpop.f32.mrb[5].mxu0  ;;  %v407_v10 = vpop.f32.mrb[5].mxu1 }
 0x111   :  { %v327_v11 = vadd.f32 %v326_v9, %v799_v47  ;;  %v408_v12 = vadd.f32 %v407_v10, %v801_v48  ;;  %v328_v13 = vpop.f32.mrb[6].mxu0  ;;  %v409_v14 = vpop.f32.mrb[6].mxu1 }
 0x112   :  { %v329_v15 = vadd.f32 %v328_v13, %v795_v45  ;;  %v410_v16 = vadd.f32 %v409_v14, %v797_v46  ;;  %v330_v17 = vpop.f32.mrb[7].mxu0  ;;  %v411_v18 = vpop.f32.mrb[7].mxu1 }
 0x113   :  { %v636_v19 = vpack.c.bf16 %v327_v11, %v325_v7  ;;  %v637_v20 = vpack.c.bf16 %v408_v12, %v406_v8  ;;  %v331_v21 = vadd.f32 %v330_v17, %v799_v47  ;;  %v412_v22 = vadd.f32 %v411_v18, %v801_v48 }
 0x115   :  { %558 = vst [vmem:[%s896_s3 + $0x20] sm:$0xff] %v636_v19  ;;  %559 = vst [vmem:[%s896_s3 + $0x28] sm:$0xff] %v637_v20  ;;  %v638_v23 = vpack.c.bf16 %v331_v21, %v329_v15  ;;  %v639_v24 = vpack.c.bf16 %v412_v22, %v410_v16 }
 0x117   :  { %560 = vst [vmem:[%s896_s3 + $0x30] sm:$0xff] %v638_v23  ;;  %561 = vst [vmem:[%s896_s3 + $0x38] sm:$0xff] %v639_v24  ;;  %v334_v25 = vpop.f32.mrb[8].mxu0  ;;  %v415_v26 = vpop.f32.mrb[8].mxu1 }
 0x118   :  { %v335_v27 = vadd.f32 %v334_v25, %v795_v45  ;;  %v416_v28 = vadd.f32 %v415_v26, %v797_v46  ;;  %v336_v29 = vpop.f32.mrb[9].mxu0  ;;  %v417_v30 = vpop.f32.mrb[9].mxu1 }
 0x119   :  { %v337_v31 = vadd.f32 %v336_v29, %v799_v47  ;;  %v418_v32 = vadd.f32 %v417_v30, %v801_v48  ;;  %v338_v33 = vpop.f32.mrb[10].mxu0  ;;  %v419_v34 = vpop.f32.mrb[10].mxu1 }
 0x11a   :  { %v339_v35 = vadd.f32 %v338_v33, %v795_v45  ;;  %v420_v36 = vadd.f32 %v419_v34, %v797_v46  ;;  %v340_v37 = vpop.f32.mrb[11].mxu0  ;;  %v421_v38 = vpop.f32.mrb[11].mxu1 }
 0x11b   :  { %v640_v39 = vpack.c.bf16 %v337_v31, %v335_v27  ;;  %v641_v40 = vpack.c.bf16 %v418_v32, %v416_v28  ;;  %v341_v41 = vadd.f32 %v340_v37, %v799_v47  ;;  %v422_v42 = vadd.f32 %v421_v38, %v801_v48 }
 0x11d   :  { %562 = vst [vmem:[%s896_s3 + $0x40] sm:$0xff] %v640_v39  ;;  %563 = vst [vmem:[%s896_s3 + $0x48] sm:$0xff] %v641_v40  ;;  %v642_v43 = vpack.c.bf16 %v341_v41, %v339_v35  ;;  %v643_v44 = vpack.c.bf16 %v422_v42, %v420_v36 }
 0x11f   :  { %564 = vst [vmem:[%s896_s3 + $0x50] sm:$0xff] %v642_v43  ;;  %565 = vst [vmem:[%s896_s3 + $0x58] sm:$0xff] %v643_v44  ;;  %v344_v49 = vpop.f32.mrb[12].mxu0  ;;  %v425_v50 = vpop.f32.mrb[12].mxu1 }
 0x120   :  { %v345_v51 = vadd.f32 %v344_v49, %v795_v45  ;;  %v426_v52 = vadd.f32 %v425_v50, %v797_v46  ;;  %v346_v53 = vpop.f32.mrb[13].mxu0  ;;  %v427_v54 = vpop.f32.mrb[13].mxu1 }
 0x121   :  { %v347_v55 = vadd.f32 %v346_v53, %v799_v47  ;;  %v428_v56 = vadd.f32 %v427_v54, %v801_v48  ;;  %v348_v57 = vpop.f32.mrb[14].mxu0  ;;  %v429_v58 = vpop.f32.mrb[14].mxu1 }
 0x122   :  { %v349_v59 = vadd.f32 %v348_v57, %v795_v45  ;;  %v430_v60 = vadd.f32 %v429_v58, %v797_v46  ;;  %v350_v61 = vpop.f32.mrb[15].mxu0  ;;  %v431_v62 = vpop.f32.mrb[15].mxu1 }
 0x123   :  { %v644_v63 = vpack.c.bf16 %v347_v55, %v345_v51  ;;  %v645_v0 = vpack.c.bf16 %v428_v56, %v426_v52  ;;  %v351_v1 = vadd.f32 %v350_v61, %v799_v47  ;;  %v432_v2 = vadd.f32 %v431_v62, %v801_v48 }
 0x125   :  { %566 = vst [vmem:[%s896_s3 + $0x60] sm:$0xff] %v644_v63  ;;  %567 = vst [vmem:[%s896_s3 + $0x68] sm:$0xff] %v645_v0  ;;  %v646_v3 = vpack.c.bf16 %v351_v1, %v349_v59  ;;  %v647_v4 = vpack.c.bf16 %v432_v2, %v430_v60 }
 0x127   :  { %568 = vst [vmem:[%s896_s3 + $0x70] sm:$0xff] %v646_v3  ;;  %569 = vst [vmem:[%s896_s3 + $0x78] sm:$0xff] %v647_v4  ;;  %v354_v5 = vpop.f32.mrb[16].mxu0  ;;  %v435_v6 = vpop.f32.mrb[16].mxu1 }
 0x128   :  { %v355_v7 = vadd.f32 %v354_v5, %v795_v45  ;;  %v436_v8 = vadd.f32 %v435_v6, %v797_v46  ;;  %v356_v9 = vpop.f32.mrb[17].mxu0  ;;  %v437_v10 = vpop.f32.mrb[17].mxu1 }
 0x129   :  { %v357_v11 = vadd.f32 %v356_v9, %v799_v47  ;;  %v438_v12 = vadd.f32 %v437_v10, %v801_v48  ;;  %v358_v13 = vpop.f32.mrb[18].mxu0  ;;  %v439_v14 = vpop.f32.mrb[18].mxu1 }
 0x12a   :  { %v359_v15 = vpop.f32.mrb[19].mxu0  ;;  %v440_v16 = vpop.f32.mrb[19].mxu1 }
 0x12b   :  { %v648_v17 = vpack.c.bf16 %v357_v11, %v355_v7  ;;  %v649_v18 = vpack.c.bf16 %v438_v12, %v436_v8 }
 0x12d   :  { %570 = vst [vmem:[%s896_s3 + $0x80] sm:$0xff] %v648_v17  ;;  %571 = vst [vmem:[%s896_s3 + $0x88] sm:$0xff] %v649_v18 }
 0x12e   :  { %576 = vsyncpa [#allocation3], 1 }

</bundles_post_ra>
